<compile_context>
chip_gen: v7x
topology: tpu7x:2x2x1
jax: 0.10.0
libtpu: 0.0.40
codegen_flags: <defaults>
</compile_context>

<pallas_src>
import functools

import numpy as np
import jax
import jax.numpy as jnp
from jax import lax
from jax.experimental import pallas as pl
from jax.experimental.pallas import tpu as pltpu

# ConvTranspose1d hyper-parameters (groups=1, padding_mode='zeros', bias=True)
IN_CHANNELS = 4
OUT_CHANNELS = 8
KERNEL_SIZE = 4
STRIDE = 2
PADDING = 1
OUTPUT_PADDING = 0
DILATION = 1
EPS = 1e-5  # BatchNorm1d default eps

BATCH = 2
L_IN = 64
C2 = 2 * OUT_CHANNELS
L_OUT = (L_IN - 1) * STRIDE - 2 * PADDING + DILATION * (KERNEL_SIZE - 1) + OUTPUT_PADDING + 1  # 128


def _phase_taps(k, stride, padding, dilation):
    """Enumerate (phase p, kernel tap kk, input shift s) with i = l2 + s contributing to
    output position l = l2*stride + p.  Static, depends only on hyper-parameters."""
    taps = []
    shifts = set()
    for p in range(stride):
        for kk in range(k):
            num = p + padding - kk * dilation
            if num % stride != 0:
                continue
            s = num // stride
            taps.append((p, kk, s))
            shifts.add(s)
    return taps, tuple(sorted(shifts))


def _gated_deconv_bn_kernel(x_ref, mask_ref, w_ref, gamma_ref, beta_ref, o_ref, *,
                            shifts, cin, stride, cout, eps, inv_count):
    """Single-program kernel.

    x_ref:     (cin, N*Lin)            input; channels on sublanes, (n, l2) on lanes
    mask_ref:  (ns, N*Lin)             trace-time boundary masks, one row per shift
    w_ref:     (stride*2*cout, ns*cin) per-phase tap matrix; rows ordered (phase, half, ch)
    gamma_ref: (2*cout, 1)             BN weight; rows ordered (half, ch)
    beta_ref:  (2*cout, 1)             BN bias
    o_ref:     (stride*cout, N*Lin)    GLU output; rows ordered (phase, ch)
    """
    x = x_ref[...]
    masks = mask_ref[...]
    ncols = x.shape[1]
    c2 = 2 * cout

    # Stack shifted (and segment-boundary-masked) input copies along sublanes.
    parts = []
    for j, s in enumerate(shifts):
        if s == 0:
            parts.append(x)
        else:
            xs = pltpu.roll(x, shift=(-s) % ncols, axis=1)   # xs[:, col] = x[:, col+s] (wrapped)
            parts.append(xs * masks[j:j + 1, :])             # zero outside each batch segment
    xstk = jnp.concatenate(parts, axis=0)                    # (ns*cin, ncols)

    # ConvTranspose as one small MXU matmul (contraction = ns*cin taps), exact f32.
    y = jnp.dot(w_ref[...], xstk,
                preferred_element_type=jnp.float32,
                precision=lax.Precision.HIGHEST)             # (stride*c2, ncols)

    # BatchNorm1d (training mode, biased variance): one pass over y, stats pooled over
    # all phases and all (n, l2) columns = N * Lout samples per channel.
    # NOTE: the ConvTranspose bias is intentionally omitted: a per-channel constant shifts
    # the batch mean and cancels exactly under train-mode BN, so the forward output is
    # unchanged.
    # TODO(synk): running_mean / running_var buffer updates are stateful bookkeeping that
    # do not affect the forward output; they are not materialized here.
    s1 = jnp.sum(y, axis=1, keepdims=True)          # (stride*c2, 1)
    s2 = jnp.sum(y * y, axis=1, keepdims=True)      # (stride*c2, 1)
    sum1 = jnp.zeros((c2, 1), jnp.float32)
    sum2 = jnp.zeros((c2, 1), jnp.float32)
    for p in range(stride):
        sum1 = sum1 + s1[p * c2:(p + 1) * c2]
        sum2 = sum2 + s2[p * c2:(p + 1) * c2]
    mean = sum1 * inv_count
    var = sum2 * inv_count - mean * mean
    scale = gamma_ref[...] * lax.rsqrt(var + eps)   # folded BN affine: y*scale + shift
    shift = beta_ref[...] - mean * scale

    # Hoist the (c2,1)->(c2,ncols) lane broadcasts out of the phase loop (no CSE in JAX).
    scale_b = jnp.broadcast_to(scale, (c2, ncols))
    shift_b = jnp.broadcast_to(shift, (c2, ncols))

    # GLU over the two channel halves, one phase at a time; write straight into o_ref.
    for p in range(stride):
        ybn = y[p * c2:(p + 1) * c2] * scale_b + shift_b     # (c2, ncols)
        a = ybn[:cout]
        g = ybn[cout:]
        o_ref[p * cout:(p + 1) * cout, :] = a * jax.nn.sigmoid(g)


@jax.jit
def gated_deconv_bn1d(x, weight, bias, gamma, beta):
    """Forward of GatedDeconvBN1d (train-mode BN).

    x: (N, Cin, Lin); weight: (Cin, 2*Cout, K); bias/gamma/beta: (2*Cout,).
    `bias` is accepted for interface parity but unused: it cancels exactly under
    train-mode BatchNorm, leaving the forward output identical.
    """
    del bias
    n, cin, l_in = x.shape
    w_cin, c2, k = weight.shape
    assert w_cin == cin
    cout = c2 // 2
    l_out = (l_in - 1) * STRIDE - 2 * PADDING + DILATION * (k - 1) + OUTPUT_PADDING + 1
    # The phase decomposition assumes the clean 2x-upsample case (every output position
    # is l2*stride + p with l2 in [0, Lin)); true for this module's hyper-parameters.
    assert l_out == STRIDE * l_in, (l_out, STRIDE, l_in)

    ncols = n * l_in
    taps, shifts = _phase_taps(k, STRIDE, PADDING, DILATION)
    ns = len(shifts)
    sidx = {s: j for j, s in enumerate(shifts)}

    # --- weight glue (~1 KiB, fused under jit): per-phase tap matrix --------------------
    # sel[p, j, kk] = 1 iff kernel tap kk feeds output phase p via input shift shifts[j].
    sel = np.zeros((STRIDE, ns, k), dtype=np.float32)
    for (p, kk, s) in taps:
        sel[p, sidx[s], kk] = 1.0
    # w_phase[p, o, j, ci] = weight[ci, o, kk] for the tap of (phase p, shift j).
    w_phase = jnp.einsum('pjk,iok->poji', jnp.asarray(sel), weight.astype(jnp.float32))
    w2d = w_phase.reshape(STRIDE * c2, ns * cin)             # rows (phase, half, ch)

    gamma2d = gamma.astype(jnp.float32).reshape(c2, 1)
    beta2d = beta.astype(jnp.float32).reshape(c2, 1)

    # --- trace-time boundary masks (depend only on lane position) -----------------------
    l2 = np.arange(ncols) % l_in
    masks = jnp.asarray(np.stack(
        [((l2 + s >= 0) & (l2 + s < l_in)).astype(np.float32) for s in shifts], axis=0))

    # Channels on sublanes, flattened (n, l2) on the 128-lane axis.
    x2d = x.astype(jnp.float32).transpose(1, 0, 2).reshape(cin, ncols)

    kernel = functools.partial(
        _gated_deconv_bn_kernel,
        shifts=shifts, cin=cin, stride=STRIDE, cout=cout,
        eps=EPS, inv_count=1.0 / float(n * l_out))

    out_k = pl.pallas_call(
        kernel,
        grid=(1,),
        in_specs=[
            pl.BlockSpec((cin, ncols), lambda i: (0, 0)),            # x
            pl.BlockSpec((ns, ncols), lambda i: (0, 0)),             # boundary masks
            pl.BlockSpec((STRIDE * c2, ns * cin), lambda i: (0, 0)),  # tap matrix
            pl.BlockSpec((c2, 1), lambda i: (0, 0)),                 # gamma
            pl.BlockSpec((c2, 1), lambda i: (0, 0)),                 # beta
        ],
        out_specs=pl.BlockSpec((STRIDE * cout, ncols), lambda i: (0, 0)),
        out_shape=jax.ShapeDtypeStruct((STRIDE * cout, ncols), jnp.float32),
        compiler_params=pltpu.CompilerParams(dimension_semantics=("arbitrary",)),
    )(x2d, masks, w2d, gamma2d, beta2d)

    # --- layout plumbing (fused under jit): rows (phase, ch), cols (n, l2) -> NCL --------
    out = (out_k.reshape(STRIDE, cout, n, l_in)
           .transpose(2, 1, 3, 0)
           .reshape(n, cout, l_out))
    return out


def reference(x, weight, bias, gamma, beta):
    """Pure-JAX reference: ConvTranspose1d as fractionally-strided conv, BN (train), GLU."""
    k = weight.shape[-1]
    rhs = jnp.flip(weight, axis=-1).transpose(1, 0, 2)   # (C2, Cin, K), OIW
    pad_lo = DILATION * (k - 1) - PADDING
    pad_hi = DILATION * (k - 1) - PADDING + OUTPUT_PADDING
    y = lax.conv_general_dilated(
        x, rhs,
        window_strides=(1,),
        padding=[(pad_lo, pad_hi)],
        lhs_dilation=(STRIDE,),
        rhs_dilation=(DILATION,),
        dimension_numbers=('NCH', 'OIH', 'NCH'),
        precision=lax.Precision.HIGHEST)
    y = y + bias[None, :, None]
    mean = jnp.mean(y, axis=(0, 2), keepdims=True)
    var = jnp.mean(jnp.square(y - mean), axis=(0, 2), keepdims=True)
    y_bn = (y - mean) * lax.rsqrt(var + EPS) * gamma[None, :, None] + beta[None, :, None]
    c_out = y.shape[1] // 2
    return y_bn[:, :c_out, :] * jax.nn.sigmoid(y_bn[:, c_out:, :])


if __name__ == "__main__":
    key = jax.random.PRNGKey(0)
    kx, kw, kb, kg, kbt = jax.random.split(key, 5)

    # Deterministic synthetic parameters (shapes from ConvTranspose1d / BatchNorm1d __init__).
    x = jax.random.normal(kx, (BATCH, IN_CHANNELS, L_IN), dtype=jnp.float32)
    w_scale = 1.0 / (IN_CHANNELS * KERNEL_SIZE) ** 0.5
    weight = w_scale * jax.random.normal(kw, (IN_CHANNELS, C2, KERNEL_SIZE), dtype=jnp.float32)
    bias = w_scale * jax.random.normal(kb, (C2,), dtype=jnp.float32)
    gamma = 1.0 + 0.1 * jax.random.normal(kg, (C2,), dtype=jnp.float32)
    beta = 0.1 * jax.random.normal(kbt, (C2,), dtype=jnp.float32)

    out = gated_deconv_bn1d(x, weight, bias, gamma, beta)
    out = jax.block_until_ready(out)

    ref = reference(x, weight, bias, gamma, beta)
    assert out.shape == (BATCH, OUT_CHANNELS, L_OUT), out.shape
    assert jnp.allclose(out, ref, atol=1e-3, rtol=1e-3), float(jnp.max(jnp.abs(out - ref)))

    print("KERNEL_OK")
</pallas_src>

<mosaic_0001>
module attributes {stable_mosaic.version = 11 : i64} {
  func.func @_gated_deconv_bn_kernel(%arg0: i32, %arg1: memref<4x128xf32, #tpu.memory_space<vmem>>, %arg2: memref<3x128xf32, #tpu.memory_space<vmem>>, %arg3: memref<32x12xf32, #tpu.memory_space<vmem>>, %arg4: memref<16x1xf32, #tpu.memory_space<vmem>>, %arg5: memref<16x1xf32, #tpu.memory_space<vmem>>, %arg6: memref<16x128xf32, #tpu.memory_space<vmem>>) attributes {dimension_semantics = [#tpu.dimension_semantics<arbitrary>], iteration_bounds = array<i64: 1>, scalar_prefetch = 0 : i64, scratch_operands = 0 : i64, tpu.core_type = #tpu.core_type<tc>, window_params = [{pipeline_mode = #tpu.pipeline_mode<synchronous>, transform_indices = @transform_0, window_bounds = array<i64: 4, 128>}, {pipeline_mode = #tpu.pipeline_mode<synchronous>, transform_indices = @transform_1, window_bounds = array<i64: 3, 128>}, {pipeline_mode = #tpu.pipeline_mode<synchronous>, transform_indices = @transform_2, window_bounds = array<i64: 32, 12>}, {pipeline_mode = #tpu.pipeline_mode<synchronous>, transform_indices = @transform_3, window_bounds = array<i64: 16, 1>}, {pipeline_mode = #tpu.pipeline_mode<synchronous>, transform_indices = @transform_4, window_bounds = array<i64: 16, 1>}, {pipeline_mode = #tpu.pipeline_mode<synchronous>, transform_indices = @transform_5, window_bounds = array<i64: 16, 128>}]} {
    %c0 = arith.constant 0 : index
    %c0_0 = arith.constant 0 : index
    %0 = vector.load %arg1[%c0, %c0_0] : memref<4x128xf32, #tpu.memory_space<vmem>>, vector<4x128xf32>
    %c0_1 = arith.constant 0 : index
    %c0_2 = arith.constant 0 : index
    %1 = vector.load %arg2[%c0_1, %c0_2] : memref<3x128xf32, #tpu.memory_space<vmem>>, vector<3x128xf32>
    %c1_i32 = arith.constant 1 : i32
    %2 = tpu.dynamic_rotate %0 by %c1_i32 dim 1 : vector<4x128xf32>, i32 -> vector<4x128xf32>
    %3 = vector.extract_strided_slice %1 {offsets = [0, 0], sizes = [1, 128], strides = [1, 1]} : vector<3x128xf32> to vector<1x128xf32>
    %4 = vector.broadcast %3 : vector<1x128xf32> to vector<4x128xf32>
    %5 = arith.mulf %2, %4 : vector<4x128xf32>
    %c127_i32 = arith.constant 127 : i32
    %6 = tpu.dynamic_rotate %0 by %c127_i32 dim 1 : vector<4x128xf32>, i32 -> vector<4x128xf32>
    %7 = vector.extract_strided_slice %1 {offsets = [2, 0], sizes = [1, 128], strides = [1, 1]} : vector<3x128xf32> to vector<1x128xf32>
    %8 = vector.broadcast %7 : vector<1x128xf32> to vector<4x128xf32>
    %9 = arith.mulf %6, %8 : vector<4x128xf32>
    %10 = tpu.concatenate %5, %0, %9 in 0 : vector<4x128xf32>, vector<4x128xf32>, vector<4x128xf32> -> vector<12x128xf32>
    %c0_3 = arith.constant 0 : index
    %c0_4 = arith.constant 0 : index
    %11 = vector.load %arg3[%c0_3, %c0_4] : memref<32x12xf32, #tpu.memory_space<vmem>>, vector<32x12xf32>
    %cst = arith.constant dense<0.000000e+00> : vector<32x128xf32>
    %12 = tpu.matmul %11, %10, %cst {dimension_numbers = #tpu.dot_dimension_numbers<[1], [0], [0], [1], [0, 0, 1, 1], [], []>, precision = #tpu.contract_precision<fp32>} : vector<32x12xf32>, vector<12x128xf32>, vector<32x128xf32> -> vector<32x128xf32>
    %cst_5 = arith.constant dense<0.000000e+00> : vector<32xf32>
    %13 = vector.multi_reduction <add>, %12, %cst_5 [1] : vector<32x128xf32> to vector<32xf32>
    %14 = vector.shape_cast %13 : vector<32xf32> to vector<32x1xf32>
    %15 = arith.mulf %12, %12 : vector<32x128xf32>
    %cst_6 = arith.constant dense<0.000000e+00> : vector<32xf32>
    %16 = vector.multi_reduction <add>, %15, %cst_6 [1] : vector<32x128xf32> to vector<32xf32>
    %17 = vector.shape_cast %16 : vector<32xf32> to vector<32x1xf32>
    %cst_7 = arith.constant 0.000000e+00 : f32
    %18 = vector.broadcast %cst_7 : f32 to vector<16x1xf32>
    %cst_8 = arith.constant 0.000000e+00 : f32
    %19 = vector.broadcast %cst_8 : f32 to vector<16x1xf32>
    %20 = vector.extract_strided_slice %14 {offsets = [0, 0], sizes = [16, 1], strides = [1, 1]} : vector<32x1xf32> to vector<16x1xf32>
    %21 = arith.addf %18, %20 : vector<16x1xf32>
    %22 = vector.extract_strided_slice %17 {offsets = [0, 0], sizes = [16, 1], strides = [1, 1]} : vector<32x1xf32> to vector<16x1xf32>
    %23 = arith.addf %19, %22 : vector<16x1xf32>
    %24 = vector.extract_strided_slice %14 {offsets = [16, 0], sizes = [16, 1], strides = [1, 1]} : vector<32x1xf32> to vector<16x1xf32>
    %25 = arith.addf %21, %24 : vector<16x1xf32>
    %26 = vector.extract_strided_slice %17 {offsets = [16, 0], sizes = [16, 1], strides = [1, 1]} : vector<32x1xf32> to vector<16x1xf32>
    %27 = arith.addf %23, %26 : vector<16x1xf32>
    %cst_9 = arith.constant 3.906250e-03 : f32
    %28 = vector.broadcast %cst_9 : f32 to vector<16x1xf32>
    %29 = arith.mulf %25, %28 : vector<16x1xf32>
    %cst_10 = arith.constant 3.906250e-03 : f32
    %30 = vector.broadcast %cst_10 : f32 to vector<16x1xf32>
    %31 = arith.mulf %27, %30 : vector<16x1xf32>
    %32 = arith.mulf %29, %29 : vector<16x1xf32>
    %33 = arith.subf %31, %32 : vector<16x1xf32>
    %c0_11 = arith.constant 0 : index
    %c0_12 = arith.constant 0 : index
    %34 = vector.load %arg4[%c0_11, %c0_12] : memref<16x1xf32, #tpu.memory_space<vmem>>, vector<16x1xf32>
    %cst_13 = arith.constant 9.99999974E-6 : f32
    %35 = vector.broadcast %cst_13 : f32 to vector<16x1xf32>
    %36 = arith.addf %33, %35 : vector<16x1xf32>
    %37 = math.rsqrt %36 : vector<16x1xf32>
    %38 = arith.mulf %34, %37 : vector<16x1xf32>
    %c0_14 = arith.constant 0 : index
    %c0_15 = arith.constant 0 : index
    %39 = vector.load %arg5[%c0_14, %c0_15] : memref<16x1xf32, #tpu.memory_space<vmem>>, vector<16x1xf32>
    %40 = arith.mulf %29, %38 : vector<16x1xf32>
    %41 = arith.subf %39, %40 : vector<16x1xf32>
    %42 = vector.shape_cast %38 : vector<16x1xf32> to vector<16x1xf32>
    %43 = vector.broadcast %42 : vector<16x1xf32> to vector<16x128xf32>
    %44 = vector.shape_cast %41 : vector<16x1xf32> to vector<16x1xf32>
    %45 = vector.broadcast %44 : vector<16x1xf32> to vector<16x128xf32>
    %46 = vector.extract_strided_slice %12 {offsets = [0, 0], sizes = [16, 128], strides = [1, 1]} : vector<32x128xf32> to vector<16x128xf32>
    %47 = arith.mulf %46, %43 : vector<16x128xf32>
    %48 = arith.addf %47, %45 : vector<16x128xf32>
    %49 = vector.extract_strided_slice %48 {offsets = [0, 0], sizes = [8, 128], strides = [1, 1]} : vector<16x128xf32> to vector<8x128xf32>
    %50 = vector.extract_strided_slice %48 {offsets = [8, 0], sizes = [8, 128], strides = [1, 1]} : vector<16x128xf32> to vector<8x128xf32>
    %51 = arith.negf %50 : vector<8x128xf32>
    %52 = math.exp %51 : vector<8x128xf32>
    %cst_16 = arith.constant 1.000000e+00 : f32
    %53 = vector.broadcast %cst_16 : f32 to vector<8x128xf32>
    %54 = arith.addf %53, %52 : vector<8x128xf32>
    %55 = arith.divf %53, %54 : vector<8x128xf32>
    %56 = arith.mulf %49, %55 : vector<8x128xf32>
    %c0_17 = arith.constant 0 : index
    %c0_18 = arith.constant 0 : index
    %57 = vector.load %arg6[%c0_17, %c0_18] : memref<16x128xf32, #tpu.memory_space<vmem>>, vector<8x128xf32>
    tpu.vector_store %arg6[%c0_17, %c0_18], %56 {strides = array<i32>} : memref<16x128xf32, #tpu.memory_space<vmem>>, vector<8x128xf32>,
    %58 = vector.extract_strided_slice %12 {offsets = [16, 0], sizes = [16, 128], strides = [1, 1]} : vector<32x128xf32> to vector<16x128xf32>
    %59 = arith.mulf %58, %43 : vector<16x128xf32>
    %60 = arith.addf %59, %45 : vector<16x128xf32>
    %61 = vector.extract_strided_slice %60 {offsets = [0, 0], sizes = [8, 128], strides = [1, 1]} : vector<16x128xf32> to vector<8x128xf32>
    %62 = vector.extract_strided_slice %60 {offsets = [8, 0], sizes = [8, 128], strides = [1, 1]} : vector<16x128xf32> to vector<8x128xf32>
    %63 = arith.negf %62 : vector<8x128xf32>
    %64 = math.exp %63 : vector<8x128xf32>
    %cst_19 = arith.constant 1.000000e+00 : f32
    %65 = vector.broadcast %cst_19 : f32 to vector<8x128xf32>
    %66 = arith.addf %65, %64 : vector<8x128xf32>
    %67 = arith.divf %65, %66 : vector<8x128xf32>
    %68 = arith.mulf %61, %67 : vector<8x128xf32>
    %c8 = arith.constant 8 : index
    %c0_20 = arith.constant 0 : index
    %69 = vector.load %arg6[%c8, %c0_20] : memref<16x128xf32, #tpu.memory_space<vmem>>, vector<8x128xf32>
    tpu.vector_store %arg6[%c8, %c0_20], %68 {strides = array<i32>} : memref<16x128xf32, #tpu.memory_space<vmem>>, vector<8x128xf32>,
    return
  }
  func.func @transform_0(%arg0: i32) -> (i32, i32) {
    %c0_i32 = arith.constant 0 : i32
    %c0_i32_0 = arith.constant 0 : i32
    %c0_i32_1 = arith.constant 0 : i32
    return %c0_i32, %c0_i32_0 : i32, i32
  }
  func.func @transform_1(%arg0: i32) -> (i32, i32) {
    %c0_i32 = arith.constant 0 : i32
    %c0_i32_0 = arith.constant 0 : i32
    %c0_i32_1 = arith.constant 0 : i32
    return %c0_i32, %c0_i32_0 : i32, i32
  }
  func.func @transform_2(%arg0: i32) -> (i32, i32) {
    %c0_i32 = arith.constant 0 : i32
    %c0_i32_0 = arith.constant 0 : i32
    %c0_i32_1 = arith.constant 0 : i32
    return %c0_i32, %c0_i32_0 : i32, i32
  }
  func.func @transform_3(%arg0: i32) -> (i32, i32) {
    %c0_i32 = arith.constant 0 : i32
    %c0_i32_0 = arith.constant 0 : i32
    %c0_i32_1 = arith.constant 0 : i32
    return %c0_i32, %c0_i32_0 : i32, i32
  }
  func.func @transform_4(%arg0: i32) -> (i32, i32) {
    %c0_i32 = arith.constant 0 : i32
    %c0_i32_0 = arith.constant 0 : i32
    %c0_i32_1 = arith.constant 0 : i32
    return %c0_i32, %c0_i32_0 : i32, i32
  }
  func.func @transform_5(%arg0: i32) -> (i32, i32) {
    %c0_i32 = arith.constant 0 : i32
    %c0_i32_0 = arith.constant 0 : i32
    %c0_i32_1 = arith.constant 0 : i32
    return %c0_i32, %c0_i32_0 : i32, i32
  }
}

</mosaic_0001>

<bundles_post_ra>
// kernel: gated_deconv_bn1d.1
= control target key start
LH: loop header
LB: loop body
LE: loop exit
PB: predicated region body
PF: predicated region fallthrough
CT: control target
= control target key end

     0   :  { %vm45_vm0 = vcmask 97280   ;;  %s906_s22 = smov 1   ;;  %v24_v14 = vlaneseq  ;;  %vm39_vm1 = vcmask 1043456   ;;  %s1022_s0 = inlined_call_operand.vmem [shape: f32[4,128], index: 0, kind: input, shape index: {}]   ;;  %s1023_s2 = inlined_call_operand.vmem [shape: f32[32,12], index: 2, kind: input, shape index: {}]   ;;  %s1024_s1 = inlined_call_operand.vmem [shape: f32[3,128], index: 1, kind: input, shape index: {}]   ;;  %s1025_s3 = inlined_call_operand.vmem [shape: f32[16,1], index: 3, kind: input, shape index: {}]   ;;  %s1026_s4 = inlined_call_operand.vmem [shape: f32[16,1], index: 4, kind: input, shape index: {}]   ;;  %s1027_s5 = inlined_call_operand.vmem [shape: f32[16,128], index: 5, kind: output, shape index: {}]  }
   0x1   :  { %v20_v0 = vld [vmem:[%s1022_s0] sm:$0xf]  ;;  %v42_v3 = vld [vmem:[%s1023_s2 + $0x8] sm:$0xff]  ;;  %v43_v4 = vld [vmem:[%s1023_s2 + $0x10] sm:$0xff]  ;;  %s907_s0 = smov 127  }
   0x2   :  { %v41_v1 = vld [vmem:[%s1023_s2] sm:$0xff]  ;;  %22 = vrot.lane.b32.xlu0 %v20_v0, %s906_s22  ;;  %v44_v5 = vld [vmem:[%s1023_s2 + $0x18] sm:$0xff]  ;;  %v50_v7 = vsel %vm45_vm0, %v42_v3, 0  ;;  %v53_v8 = vsel %vm45_vm0, %v43_v4, 0  ;;  %v25_v15 = vshrl.u32 %v24_v14, 7  ;;  %v37_v22 = vrot.slane %v20_v0, 4 }
   0x3   :  { %v47_v2 = vsel %vm45_vm0, %v41_v1, 0  ;;  %v56_v9 = vsel %vm45_vm0, %v44_v5, 0  ;;  %v21_v17 = vld [vmem:[%s1024_s1] sm:$0x7]  ;;  %v964_v18 = vand.u32 4294901760, %v50_v7  ;;  %v966_v21 = vand.u32 4294901760, %v53_v8 }
   0x4   :  { %v954_v6 = vand.u32 4294901760, %v47_v2  ;;  %v26_v16 = vsub.s32 0, %v25_v15  ;;  %v33_v20 = vsub.s32 2, %v25_v15  ;;  %v969_v25 = vand.u32 4294901760, %v56_v9 }
   0x5   :  { %v139_v24 = vsub.f32 %v50_v7, %v964_v18  ;;  %v149_v28 = vsub.f32 %v53_v8, %v966_v21 }
   0x6   :  { %v957_v10 = vsub.f32 %v47_v2, %v954_v6  ;;  %29 = vrot.lane.b32.xlu0 %v20_v0, %s907_s0  ;;  %v27_v19 = vrot.slane %v21_v17, %v26_v16  ;;  %v34_v27 = vrot.slane %v21_v17, %v33_v20  ;;  %v159_v33 = vsub.f32 %v56_v9, %v969_v25 }
   0x7   :  { %v140_v32 = vand.u32 4294901760, %v139_v24  ;;  %v150_v35 = vand.u32 4294901760, %v149_v28  ;;  %v908_v9 = vmov 0  }
   0x8   :  { %v130_v11 = vand.u32 4294901760, %v957_v10  ;;  %v160_v41 = vand.u32 4294901760, %v159_v33  ;;  %892 = vset.pattern.permute.xlu1 %v908_v9  ;;  %893 = vset.pattern.permute.xlu0 %v908_v9 }
   0x9   :  { %v141_v39 = vsub.f32 %v139_v24, %v140_v32  ;;  %v151_v42 = vsub.f32 %v149_v28, %v150_v35 }
   0xa   :  { %v131_v12 = vsub.f32 %v957_v10, %v130_v11  ;;  %819 = vmatprep.mubr.f32.mxu0 %v130_v11  ;;  %v161_v47 = vsub.f32 %v159_v33, %v160_v41 }
   0xb   :  { %v142_v45 = vand.u32 4294901760, %v141_v39  ;;  %v152_v49 = vand.u32 4294901760, %v151_v42 }
   0xc   :  { %v132_v13 = vand.u32 4294901760, %v131_v12  ;;  %v162_v52 = vand.u32 4294901760, %v161_v47 }
   0xe   :  { %789 = vmatprep.mubr.f32.mxu1 %v132_v13 }
  0x74   :  { %v23_v23 = vpop.permute.xlu0 %22 }
  0x75   :  { %v28_v26 = vmul.f32 %v27_v19, %v23_v23 }
  0x77   :  { %v40_v29 = vsel %vm39_vm1, %v28_v26, %v37_v22 }
  0x78   :  { %v30_v30 = vpop.permute.xlu0 %29  ;;  %v62_v31 = vand.u32 4294901760, %v40_v29 }
  0x79   :  { %v35_v34 = vmul.f32 %v34_v27, %v30_v30 }
  0x7a   :  { %v170_v36 = vsub.f32 %v40_v29, %v62_v31 }
  0x7b   :  { %v59_v37 = vsel %vm39_vm1, %v35_v34, 0  ;;  %v694_v34 = vld [vmem:[%s1026_s4 + $0x8] sm:$0xff] }
  0x7c   :  { %v65_v38 = vand.u32 4294901760, %v59_v37  ;;  %v171_v40 = vand.u32 4294901760, %v170_v36 }
  0x7e   :  { %v845_v43 = vpack.c.bf16 %v65_v38, %v62_v31  ;;  %v177_v44 = vsub.f32 %v59_v37, %v65_v38  ;;  %v172_v48 = vsub.f32 %v170_v36, %v171_v40  ;;  %v685_v38 = vld [vmem:[%s1025_s3] sm:$0xff] }
  0x80   :  { %846 = vmatprep.subr.bf16.mxu1 %v845_v43  ;;  %858 = vmatprep.subr.bf16.mxu0 %v845_v43  ;;  %v178_v46 = vand.u32 4294901760, %v177_v44  ;;  %v173_v53 = vand.u32 4294901760, %v172_v48  ;;  %v853_v56 = vpack.c.bf16 %v177_v44, %v170_v36 }
  0x81   :  { %848 = vmatpush3.bf16.msra.mxu1 %v845_v43  ;;  %860 = vmatpush3.bf16.msra.mxu0 %v845_v43 }
  0x82   :  { %v861_v50 = vpack.c.bf16 %v178_v46, %v171_v40  ;;  %v179_v51 = vsub.f32 %v177_v44, %v178_v46 }
  0x84   :  { %790 = vmatmul.mubr.f32.vlgmr.msra.gmra.mrb[0].mxu1 %v142_v45  ;;  %820 = vmatmul.mubr.f32.vlgmr.msra.gmra.mrb[0].mxu0 %v140_v32  ;;  %v180_v54 = vand.u32 4294901760, %v179_v51 }
  0x85   :  { %862 = vmatprep.subr.bf16.mxu0 %v861_v50  ;;  %792 = vmatprep.mubr.f32.mxu1 %v152_v49 }
  0x86   :  { %864 = vmatpush3.bf16.msra.mxu0 %v861_v50  ;;  %822 = vmatprep.mubr.f32.mxu0 %v150_v35  ;;  %v849_v55 = vpack.c.bf16 %v180_v54, %v173_v53 }
  0x87   :  { %866 = vmatprep.subr.bf16.mxu0 %v845_v43 }
  0x88   :  { %793 = vmatmul.mubr.f32.gmra.mrb[2].mxu1 %v162_v52  ;;  %850 = vmatprep.subr.bf16.mxu1 %v849_v55 }
  0x89   :  { %823 = vmatmul.mubr.f32.gmra.mrb[2].mxu0 %v160_v41  ;;  %852 = vmatpush3.bf16.msra.mxu1 %v849_v55  ;;  %v693_v41 = vld [vmem:[%s1026_s4] sm:$0xff] }
  0x8a   :  { %854 = vmatprep.subr.bf16.mxu1 %v853_v56  ;;  %799 = vmatprep.mubr.f32.mxu1 %v954_v6 }
  0x8b   :  { %829 = vmatprep.mubr.f32.mxu0 %v954_v6 }
  0x8c   :  { %800 = vmatmul.mubr.f32.vlgmr.msra.gmra.mrb[0].mxu1 %v964_v18 }
  0x8d   :  { %830 = vmatmul.mubr.f32.vlgmr.msra.gmra.mrb[0].mxu0 %v964_v18  ;;  %856 = vmatpush3.bf16.msra.mxu1 %v853_v56 }
  0x8e   :  { %868 = vmatpush3.bf16.msra.mxu0 %v845_v43  ;;  %802 = vmatprep.mubr.f32.mxu1 %v966_v21 }
  0x8f   :  { %832 = vmatprep.mubr.f32.mxu0 %v966_v21 }
  0x90   :  { %803 = vmatmul.mubr.f32.gmra.mrb[2].mxu1 %v969_v25 }
  0x91   :  { %833 = vmatmul.mubr.f32.gmra.mrb[2].mxu0 %v969_v25  ;;  %809 = vmatprep.mubr.f32.mxu1 %v957_v10 }
  0x92   :  { %839 = vmatprep.mubr.f32.mxu0 %v954_v6 }
  0x94   :  { %810 = vmatmul.mubr.f32.vlgmr.msra.gmra.mrb[0].mxu1 %v139_v24 }
  0x95   :  { %840 = vmatmul.mubr.f32.vlgmr.msra.gmra.mrb[0].mxu0 %v964_v18  ;;  %812 = vmatprep.mubr.f32.mxu1 %v149_v28  ;;  %v686_v28 = vld [vmem:[%s1025_s3 + $0x8] sm:$0xff] }
  0x96   :  { %842 = vmatprep.mubr.f32.mxu0 %v966_v21 }
  0x98   :  { %813 = vmatmul.mubr.f32.gmra.mrb[2].mxu1 %v159_v33 }
  0x99   :  { %843 = vmatmul.mubr.f32.gmra.mrb[2].mxu0 %v969_v25 }
 0x167   :  { %v811_v57 = vpop.f32.mrb[0].mxu1 }
 0x168   :  { %v841_v58 = vpop.f32.mrb[0].mxu0  ;;  %v339_v59 = vpop.f32.mrb[1].mxu1 }
 0x169   :  { %v986_v60 = vadd.f32 %v841_v58, %v811_v57  ;;  %v627_v61 = vpop.f32.mrb[1].mxu0 }
 0x16a   :  { %v988_v62 = vadd.f32 %v627_v61, %v339_v59 }
 0x16b   :  { %651 = vadd.xlane.f32.xlu1 %v986_v60  ;;  %v814_v63 = vpop.f32.mrb[2].mxu1  ;;  %v658_v0 = vmul.f32 %v986_v60, %v986_v60 }
 0x16c   :  { %v844_v1 = vpop.f32.mrb[2].mxu0  ;;  %v353_v2 = vpop.f32.mrb[3].mxu1  ;;  %v657_v7 = vmul.f32 %v988_v62, %v988_v62 }
 0x16d   :  { %v871_v3 = vadd.f32 %v844_v1, %v814_v63  ;;  %v639_v4 = vpop.f32.mrb[3].mxu0  ;;  %663 = vadd.xlane.f32.xlu0 %v658_v0 }
 0x16e   :  { %v993_v5 = vadd.f32 %v639_v4, %v353_v2 }
 0x16f   :  { %655 = vadd.xlane.f32.xlu1 %v871_v3  ;;  %v660_v6 = vmul.f32 %v871_v3, %v871_v3 }
 0x170   :  { %v659_v8 = vmul.f32 %v993_v5, %v993_v5 }
 0x173   :  { %667 = vadd.xlane.f32.xlu1 %v660_v6 }
 0x177   :  { %649 = vadd.xlane.f32.xlu1 %v988_v62 }
 0x17b   :  { %653 = vadd.xlane.f32.xlu1 %v993_v5 }
 0x17f   :  { %661 = vadd.xlane.f32.xlu1 %v657_v7 }
 0x183   :  { %665 = vadd.xlane.f32.xlu1 %v659_v8 }
 0x1f8   :  { %v652_v10 = vpop.xlane.xlu1 %651 }
 0x1fa   :  { %v664_v14 = vpop.xlane.xlu0 %663 }
 0x1fc   :  { %v656_v11 = vpop.xlane.xlu1 %655 }
 0x1fd   :  { %v674_v12 = vadd.f32 %v656_v11, %v652_v10 }
 0x1ff   :  { %v678_v13 = vmul.f32 0.00390625, %v674_v12 }
 0x200   :  { %v668_v15 = vpop.xlane.xlu1 %667 }
 0x201   :  { %v676_v16 = vadd.f32 %v668_v15, %v664_v14  ;;  %v682_v17 = vmul.f32 %v678_v13, %v678_v13 }
 0x203   :  { %v680_v18 = vmul.f32 0.00390625, %v676_v16 }
 0x204   :  { %v650_v19 = vpop.xlane.xlu1 %649 }
 0x205   :  { %v684_v20 = vsub.f32 %v680_v18, %v682_v17 }
 0x207   :  { %v688_v21 = vadd.f32 1e-05, %v684_v20 }
 0x208   :  { %v654_v22 = vpop.xlane.xlu1 %653 }
 0x209   :  { %894 = vrsqrt.f32 %v688_v21  ;;  %v673_v23 = vadd.f32 %v654_v22, %v650_v19 }
 0x20b   :  { %v677_v25 = vmul.f32 0.00390625, %v673_v23 }
 0x20c   :  { %v662_v24 = vpop.xlane.xlu1 %661 }
 0x20d   :  { %v681_v30 = vmul.f32 %v677_v25, %v677_v25 }
 0x210   :  { %v666_v26 = vpop.xlane.xlu1 %665 }
 0x211   :  { %v675_v27 = vadd.f32 %v666_v26, %v662_v24 }
 0x213   :  { %v895_v29 = vpop.eup %894  ;;  %v679_v31 = vmul.f32 0.00390625, %v675_v27 }
 0x214   :  { %v692_v32 = vmul.f32 %v895_v29, %v686_v28 }
 0x215   :  { %v683_v33 = vsub.f32 %v679_v31, %v681_v30 }
 0x216   :  { %706 = vperm.xlu1 %892, %v692_v32   ;;  %v696_v35 = vmul.f32 %v692_v32, %v678_v13 }
 0x217   :  { %v687_v36 = vadd.f32 1e-05, %v683_v33 }
 0x218   :  { %v698_v37 = vsub.f32 %v694_v34, %v696_v35 }
 0x219   :  { %896 = vrsqrt.f32 %v687_v36 }
 0x21a   :  { %716 = vperm.xlu0 %893, %v698_v37  }
 0x223   :  { %v897_v39 = vpop.eup %896 }
 0x224   :  { %v691_v40 = vmul.f32 %v897_v39, %v685_v38 }
 0x226   :  { %701 = vperm.xlu1 %892, %v691_v40   ;;  %v695_v42 = vmul.f32 %v691_v40, %v677_v25 }
 0x228   :  { %v697_v43 = vsub.f32 %v693_v41, %v695_v42 }
 0x22a   :  { %711 = vperm.xlu1 %892, %v697_v43  }
 0x295   :  { %v707_v44 = vpop.permute.xlu1 %706 }
 0x296   :  { %v720_v45 = vmul.f32 %v986_v60, %v707_v44  ;;  %v732_v46 = vmul.f32 %v871_v3, %v707_v44 }
 0x299   :  { %v717_v47 = vpop.permute.xlu0 %716 }
 0x29a   :  { %v722_v48 = vadd.f32 %v720_v45, %v717_v47  ;;  %v734_v49 = vadd.f32 %v732_v46, %v717_v47 }
 0x29c   :  { %v747_v50 = vmul.f32 -1.442695, %v722_v48  ;;  %v748_v51 = vmul.f32 -1.442695, %v734_v49 }
 0x29e   :  { %898 = vpow2.f32 %v747_v50 }
 0x29f   :  { %900 = vpow2.f32 %v748_v51 }
 0x2a5   :  { %v702_v56 = vpop.permute.xlu1 %701 }
 0x2a6   :  { %v719_v58 = vmul.f32 %v988_v62, %v702_v56  ;;  %v731_v59 = vmul.f32 %v993_v5, %v702_v56 }
 0x2a8   :  { %v899_v52 = vpop.eup %898 }
 0x2a9   :  { %v901_v53 = vpop.eup %900  ;;  %v726_v54 = vadd.f32 1.0, %v899_v52  ;;  %v712_v57 = vpop.permute.xlu1 %711 }
 0x2aa   :  { %v738_v55 = vadd.f32 1.0, %v901_v53  ;;  %v721_v60 = vadd.f32 %v719_v58, %v712_v57  ;;  %v733_v63 = vadd.f32 %v731_v59, %v712_v57 }
 0x2ab   :  { %902 = vrcp.f32 %v726_v54 }
 0x2ac   :  { %904 = vrcp.f32 %v738_v55 }
 0x2b5   :  { %v903_v61 = vpop.eup %902 }
 0x2b6   :  { %v905_v0 = vpop.eup %904  ;;  %v729_v1 = vmul.f32 %v903_v61, %v721_v60 }
 0x2b7   :  { %v741_v2 = vmul.f32 %v905_v0, %v733_v63 }
 0x2b8   :  { %730 = vst [vmem:[%s1027_s5] sm:$0xff] %v729_v1 }
 0x2b9   :  { %742 = vst [vmem:[%s1027_s5 + $0x8] sm:$0xff] %v741_v2 }

</bundles_post_ra>
